<compile_context>
chip_gen: v7x
topology: tpu7x:2x2x1
jax: 0.10.0
libtpu: 0.0.40
codegen_flags: <defaults>
</compile_context>

<pallas_src>
import functools

import jax
import jax.numpy as jnp
from jax import lax
from jax.experimental import pallas as pl
from jax.experimental.pallas import tpu as pltpu


# ------------------------------ fused Pallas kernel ------------------------------ #

def _softplus(z):
    # numerically stable softplus = max(z,0) + log1p(exp(-|z|))
    return jnp.maximum(z, 0.0) + jnp.log1p(jnp.exp(-jnp.abs(z)))


_NT = (((1,), (1,)), ((), ()))  # contract last dims of both operands: x @ W^T


def make_fused_kernel(num_iters, lr, inv_n, beta1=0.9, beta2=0.999, eps=1e-8):
    """Per-batch-row fused kernel: whole inner Adam loop + final decode."""

    def kernel(sensor_ref, b3sel_ref, w3sel_ref, e0_ref,
               w1_ref, b1_ref, w2_ref, b2_ref, w3_ref, b3_ref, out_ref):

        def hidden(e):
            z1 = jnp.dot(e, w1_ref[...], preferred_element_type=jnp.float32) + b1_ref[...]
            h1 = _softplus(z1)
            z2 = jnp.dot(h1, w2_ref[...], preferred_element_type=jnp.float32) + b2_ref[...]
            h2 = _softplus(z2)
            return h1, h2

        def energy_grad(e):
            h1, h2 = hidden(e)
            w3sel = w3sel_ref[...]                       # (Sf, Hp): rows of W3^T at sensor locs
            # gather: pred[s] = (h2 @ W3 + b3)[loc[s]]   (no Dout-wide intermediate)
            pred = lax.dot_general(h2, w3sel, _NT,
                                   preferred_element_type=jnp.float32) + b3sel_ref[...]
            diff = pred - sensor_ref[...]
            g_s = jnp.clip(diff, -1.0, 1.0) * inv_n      # d(huber, mean)/d(pred), delta=1
            # scatter-add + (gout @ W3^T) collapsed onto the nonzero columns only
            g_h2 = jnp.dot(g_s, w3sel, preferred_element_type=jnp.float32)
            g_z2 = g_h2 * (1.0 - jnp.exp(-h2))           # sigmoid(z) = 1 - exp(-softplus(z))
            g_h1 = lax.dot_general(g_z2, w2_ref[...], _NT,
                                   preferred_element_type=jnp.float32)
            g_z1 = g_h1 * (1.0 - jnp.exp(-h1))
            return lax.dot_general(g_z1, w1_ref[...], _NT,
                                   preferred_element_type=jnp.float32)

        def adam_step(_, carry):
            e, m, v, p1, p2 = carry
            g = energy_grad(e)
            m = beta1 * m + (1.0 - beta1) * g
            v = beta2 * v + (1.0 - beta2) * g * g
            p1 = p1 * beta1                              # beta1**t carried as (1,1)
            p2 = p2 * beta2                              # beta2**t carried as (1,1)
            mhat = m / (1.0 - p1)
            vhat = v / (1.0 - p2)
            e = e - lr * mhat / (jnp.sqrt(vhat) + eps)
            return e, m, v, p1, p2

        e0 = e0_ref[...]
        zeros = jnp.zeros_like(e0)
        one = jnp.ones((1, 1), jnp.float32)
        e_fin, _, _, _, _ = lax.fori_loop(0, num_iters, adam_step,
                                          (e0, zeros, zeros, one, one))

        # final full decode — the only place the Dout-wide output is materialized
        _, h2 = hidden(e_fin)
        out_ref[...] = jnp.dot(h2, w3_ref[...],
                               preferred_element_type=jnp.float32) + b3_ref[...]

    return kernel


# ------------------------------ JAX wrapper ------------------------------ #

def xavier_uniform(key, shape):
    fan_out, fan_in = shape[0], shape[1]
    a = jnp.sqrt(6.0 / (fan_in + fan_out))
    return jax.random.uniform(key, shape, jnp.float32, -a, a)


def init_params(key, num_embed, hidden, d_out):
    k1, k2, k3, k4, k5, k6 = jax.random.split(key, 6)
    # PyTorch Linear weight is (out,in); we store the (in,out) transpose (y = x @ W + b),
    # xavier bound is symmetric in fan_in/fan_out so the distribution matches.
    W1 = xavier_uniform(k1, (num_embed, hidden))
    W2 = xavier_uniform(k2, (hidden, hidden))
    W3 = xavier_uniform(k3, (hidden, d_out))
    b1 = jax.random.uniform(k4, (1, hidden), jnp.float32, -1.0, 1.0) / jnp.sqrt(num_embed)
    b2 = jax.random.uniform(k5, (1, hidden), jnp.float32, -1.0, 1.0) / jnp.sqrt(hidden)
    b3 = jax.random.uniform(k6, (1, d_out), jnp.float32, -1.0, 1.0) / jnp.sqrt(hidden)
    return dict(W1=W1, b1=b1, W2=W2, b2=b2, W3=W3, b3=b3)


@functools.partial(jax.jit,
                   static_argnames=("time_step", "num_nodes", "num_iters", "lr"))
def model_forward(sensor_data, sensor_loc, embed0, params,
                  *, time_step, num_nodes, num_iters, lr):
    """sensor_data/sensor_loc: (B, timeStepModel, 2, numSensor).
    Returns statePred of shape (B, timeStepModel, 2, numNodes)."""
    del time_step  # implied by sensor_data.shape
    B, T, C, S = sensor_data.shape
    E = embed0.shape[1]
    W1, b1, W2, b2, W3, b3 = (params[k] for k in ("W1", "b1", "W2", "b2", "W3", "b3"))
    Hh = W1.shape[1]
    Dout = W3.shape[1]

    # ---- zero-pad hidden to a lane-dense multiple of 128 (mathematically exact) ----
    HP = ((Hh + 127) // 128) * 128
    ph = HP - Hh
    W1p = jnp.pad(W1, ((0, 0), (0, ph)))
    b1p = jnp.pad(b1, ((0, 0), (0, ph)))
    W2p = jnp.pad(W2, ((0, ph), (0, ph)))
    b2p = jnp.pad(b2, ((0, 0), (0, ph)))
    W3p = jnp.pad(W3, ((0, ph), (0, 0)))

    # ---- one-time (outside the loop) sensor-location preprocessing ----
    Sf = T * C * S
    t_idx = jnp.arange(T, dtype=jnp.int32)[None, :, None, None]
    c_idx = jnp.arange(C, dtype=jnp.int32)[None, None, :, None]
    flat_loc = ((t_idx * C + c_idx) * num_nodes + sensor_loc).reshape(B, Sf)

    sensor_flat = sensor_data.reshape(B, 1, Sf).astype(jnp.float32)
    w3t_sel = jnp.take(W3p.T, flat_loc, axis=0)                 # (B, Sf, HP) rows of W3^T
    b3_sel = jnp.take(b3[0], flat_loc, axis=0).reshape(B, 1, Sf)
    embed3 = embed0.reshape(B, 1, E)

    inv_n = 1.0 / float(B * T * C * S)                          # huber mean reduction
    kernel = make_fused_kernel(num_iters, lr, inv_n)

    out = pl.pallas_call(
        kernel,
        out_shape=jax.ShapeDtypeStruct((B, 1, Dout), jnp.float32),
        grid=(B,),
        in_specs=[
            pl.BlockSpec((None, 1, Sf), lambda b: (b, 0, 0)),    # sensor data (flattened)
            pl.BlockSpec((None, 1, Sf), lambda b: (b, 0, 0)),    # b3 gathered at sensors
            pl.BlockSpec((None, Sf, HP), lambda b: (b, 0, 0)),   # W3^T rows at sensors
            pl.BlockSpec((None, 1, E), lambda b: (b, 0, 0)),     # embed init
            pl.BlockSpec((E, HP), lambda b: (0, 0)),             # W1
            pl.BlockSpec((1, HP), lambda b: (0, 0)),             # b1
            pl.BlockSpec((HP, HP), lambda b: (0, 0)),            # W2
            pl.BlockSpec((1, HP), lambda b: (0, 0)),             # b2
            pl.BlockSpec((HP, Dout), lambda b: (0, 0)),          # W3 (final decode only)
            pl.BlockSpec((1, Dout), lambda b: (0, 0)),           # b3
        ],
        out_specs=pl.BlockSpec((None, 1, Dout), lambda b: (b, 0, 0)),
        compiler_params=pltpu.CompilerParams(
            dimension_semantics=("parallel",)),                  # v7x: shard rows over 2 TCs
    )(sensor_flat, b3_sel, w3t_sel, embed3, W1p, b1p, W2p, b2p, W3p, b3)

    return out.reshape(B, T, 2, num_nodes)


# ------------------------------ pure-JAX reference ------------------------------ #

def ref_forward(sensor_data, sensor_loc, embed0, params, *, num_nodes, num_iters, lr):
    B, T, C, S = sensor_data.shape
    W1, b1, W2, b2, W3, b3 = (params[k] for k in ("W1", "b1", "W2", "b2", "W3", "b3"))

    def decode(e):
        h1 = jax.nn.softplus(e @ W1 + b1)
        h2 = jax.nn.softplus(h1 @ W2 + b2)
        return (h2 @ W3 + b3).reshape(B, T, 2, num_nodes)

    def energy(e):
        pred = jnp.take_along_axis(decode(e), sensor_loc, axis=3)
        d = pred - sensor_data
        ad = jnp.abs(d)
        return jnp.mean(jnp.where(ad < 1.0, 0.5 * d * d, ad - 0.5))  # huber, delta=1

    beta1, beta2, eps = 0.9, 0.999, 1e-8

    def step(i, carry):
        e, m, v = carry
        g = jax.grad(energy)(e)
        m = beta1 * m + (1.0 - beta1) * g
        v = beta2 * v + (1.0 - beta2) * g * g
        t = (i + 1).astype(jnp.float32)
        mhat = m / (1.0 - beta1 ** t)
        vhat = v / (1.0 - beta2 ** t)
        return e - lr * mhat / (jnp.sqrt(vhat) + eps), m, v

    z = jnp.zeros_like(embed0)
    e, _, _ = lax.fori_loop(0, num_iters, step, (embed0, z, z))
    return decode(e)


# ----------------------------------- main ----------------------------------- #

if __name__ == "__main__":
    # Small, module-consistent shapes.
    B = 2                   # currentBatchSize
    NUM_EMBED = 8           # hp.numEmbed
    TIME_STEP = 2           # hp.timeStepModel
    H = W = 8               # imDim -> numNodes = 64
    NUM_NODES = H * W
    NUM_SENSOR = 16
    HIDDEN = 64             # fixed by the module: Linear(numEmbed, 64), Linear(64, 64)
    D_OUT = NUM_NODES * 2 * TIME_STEP
    NUM_INNER_ITERS = 8     # hp.numInnerItersTest (kept small for the demo)
    LR = 5e-2               # hp.innerLrTest

    key = jax.random.PRNGKey(0)
    kp, ke, kd, kl = jax.random.split(key, 4)

    params = init_params(kp, NUM_EMBED, HIDDEN, D_OUT)

    # embed init: nn.init.xavier_uniform_ on a (B, numEmbed) zero tensor.
    embed0 = xavier_uniform(ke, (B, NUM_EMBED))

    sensor_data = jax.random.normal(kd, (B, TIME_STEP, 2, NUM_SENSOR), jnp.float32)
    sensor_loc = jax.random.randint(kl, (B, TIME_STEP, 2, NUM_SENSOR), 0, NUM_NODES,
                                    dtype=jnp.int32)

    state_pred = model_forward(
        sensor_data, sensor_loc, embed0, params,
        time_step=TIME_STEP, num_nodes=NUM_NODES,
        num_iters=NUM_INNER_ITERS, lr=LR,
    )
    state_pred = jax.block_until_ready(state_pred)

    # Correctness: the fused Pallas kernel must match a pure-JAX/autodiff reference
    # of the full inner-loop forward (also validates the hidden-dim padding is exact).
    ref = ref_forward(sensor_data, sensor_loc, embed0, params,
                      num_nodes=NUM_NODES, num_iters=NUM_INNER_ITERS, lr=LR)

    assert state_pred.shape == (B, TIME_STEP, 2, NUM_NODES)
    assert bool(jnp.all(jnp.isfinite(state_pred)))
    assert bool(jnp.allclose(state_pred, ref, atol=3e-3, rtol=3e-3))

    print("KERNEL_OK")
</pallas_src>

<mosaic_0001>
module attributes {stable_mosaic.version = 11 : i64} {
  func.func @kernel(%arg0: i32, %arg1: memref<1x1x64xf32, #tpu.memory_space<vmem>>, %arg2: memref<1x1x64xf32, #tpu.memory_space<vmem>>, %arg3: memref<1x64x128xf32, #tpu.memory_space<vmem>>, %arg4: memref<1x1x8xf32, #tpu.memory_space<vmem>>, %arg5: memref<8x128xf32, #tpu.memory_space<vmem>>, %arg6: memref<1x128xf32, #tpu.memory_space<vmem>>, %arg7: memref<128x128xf32, #tpu.memory_space<vmem>>, %arg8: memref<1x128xf32, #tpu.memory_space<vmem>>, %arg9: memref<128x256xf32, #tpu.memory_space<vmem>>, %arg10: memref<1x256xf32, #tpu.memory_space<vmem>>, %arg11: memref<1x1x256xf32, #tpu.memory_space<vmem>>) attributes {dimension_semantics = [#tpu.dimension_semantics<parallel>], iteration_bounds = array<i64: 2>, scalar_prefetch = 0 : i64, scratch_operands = 0 : i64, tpu.core_type = #tpu.core_type<tc>, window_params = [{transform_indices = @transform_0, window_bounds = array<i64: 1, 1, 64>}, {transform_indices = @transform_1, window_bounds = array<i64: 1, 1, 64>}, {transform_indices = @transform_2, window_bounds = array<i64: 1, 64, 128>}, {transform_indices = @transform_3, window_bounds = array<i64: 1, 1, 8>}, {pipeline_mode = #tpu.pipeline_mode<synchronous>, transform_indices = @transform_4, window_bounds = array<i64: 8, 128>}, {pipeline_mode = #tpu.pipeline_mode<synchronous>, transform_indices = @transform_5, window_bounds = array<i64: 1, 128>}, {pipeline_mode = #tpu.pipeline_mode<synchronous>, transform_indices = @transform_6, window_bounds = array<i64: 128, 128>}, {pipeline_mode = #tpu.pipeline_mode<synchronous>, transform_indices = @transform_7, window_bounds = array<i64: 1, 128>}, {pipeline_mode = #tpu.pipeline_mode<synchronous>, transform_indices = @transform_8, window_bounds = array<i64: 128, 256>}, {pipeline_mode = #tpu.pipeline_mode<synchronous>, transform_indices = @transform_9, window_bounds = array<i64: 1, 256>}, {transform_indices = @transform_10, window_bounds = array<i64: 1, 1, 256>}]} {
    %c0 = arith.constant 0 : index
    %c0_0 = arith.constant 0 : index
    %c0_1 = arith.constant 0 : index
    %0 = vector.load %arg4[%c0, %c0_0, %c0_1] : memref<1x1x8xf32, #tpu.memory_space<vmem>>, vector<1x1x8xf32>
    %1 = vector.shape_cast %0 : vector<1x1x8xf32> to vector<1x8xf32>
    %cst = arith.constant 0.000000e+00 : f32
    %2 = vector.broadcast %cst : f32 to vector<1x8xf32>
    %cst_2 = arith.constant 1.000000e+00 : f32
    %3 = vector.broadcast %cst_2 : f32 to vector<1x1xf32>
    %c0_i32 = arith.constant 0 : i32
    %c8_i32 = arith.constant 8 : i32
    %4 = arith.addi %c0_i32, %c8_i32 : i32
    %c1_i32 = arith.constant 1 : i32
    %5:5 = scf.for %arg12 = %c0_i32 to %4 step %c1_i32 iter_args(%arg13 = %1, %arg14 = %2, %arg15 = %2, %arg16 = %3, %arg17 = %3) -> (vector<1x8xf32>, vector<1x8xf32>, vector<1x8xf32>, vector<1x1xf32>, vector<1x1xf32>)  : i32 {
      %c0_25 = arith.constant 0 : index
      %c0_26 = arith.constant 0 : index
      %37 = vector.load %arg5[%c0_25, %c0_26] : memref<8x128xf32, #tpu.memory_space<vmem>>, vector<8x128xf32>
      %cst_27 = arith.constant dense<0.000000e+00> : vector<1x128xf32>
      %38 = tpu.matmul %arg13, %37, %cst_27 {dimension_numbers = #tpu.dot_dimension_numbers<[1], [0], [0], [1], [0, 0, 1, 1], [], []>} : vector<1x8xf32>, vector<8x128xf32>, vector<1x128xf32> -> vector<1x128xf32>
      %c0_28 = arith.constant 0 : index
      %c0_29 = arith.constant 0 : index
      %39 = vector.load %arg6[%c0_28, %c0_29] : memref<1x128xf32, #tpu.memory_space<vmem>>, vector<1x128xf32>
      %40 = arith.addf %38, %39 : vector<1x128xf32>
      %cst_30 = arith.constant 0.000000e+00 : f32
      %41 = vector.broadcast %cst_30 : f32 to vector<1x128xf32>
      %42 = arith.maximumf %40, %41 : vector<1x128xf32>
      %43 = math.absf %40 : vector<1x128xf32>
      %cst_31 = arith.constant 0.000000e+00 : f32
      %44 = vector.broadcast %cst_31 : f32 to vector<1x128xf32>
      %45 = arith.subf %44, %43 : vector<1x128xf32>
      %46 = math.exp %45 : vector<1x128xf32>
      %47 = math.log1p %46 : vector<1x128xf32>
      %48 = arith.addf %42, %47 : vector<1x128xf32>
      %c0_32 = arith.constant 0 : index
      %c0_33 = arith.constant 0 : index
      %49 = vector.load %arg7[%c0_32, %c0_33] : memref<128x128xf32, #tpu.memory_space<vmem>>, vector<128x128xf32>
      %cst_34 = arith.constant dense<0.000000e+00> : vector<1x128xf32>
      %50 = tpu.matmul %48, %49, %cst_34 {dimension_numbers = #tpu.dot_dimension_numbers<[1], [0], [0], [1], [0, 0, 1, 1], [], []>} : vector<1x128xf32>, vector<128x128xf32>, vector<1x128xf32> -> vector<1x128xf32>
      %c0_35 = arith.constant 0 : index
      %c0_36 = arith.constant 0 : index
      %51 = vector.load %arg8[%c0_35, %c0_36] : memref<1x128xf32, #tpu.memory_space<vmem>>, vector<1x128xf32>
      %52 = arith.addf %50, %51 : vector<1x128xf32>
      %cst_37 = arith.constant 0.000000e+00 : f32
      %53 = vector.broadcast %cst_37 : f32 to vector<1x128xf32>
      %54 = arith.maximumf %52, %53 : vector<1x128xf32>
      %55 = math.absf %52 : vector<1x128xf32>
      %cst_38 = arith.constant 0.000000e+00 : f32
      %56 = vector.broadcast %cst_38 : f32 to vector<1x128xf32>
      %57 = arith.subf %56, %55 : vector<1x128xf32>
      %58 = math.exp %57 : vector<1x128xf32>
      %59 = math.log1p %58 : vector<1x128xf32>
      %60 = arith.addf %54, %59 : vector<1x128xf32>
      %c0_39 = arith.constant 0 : index
      %c0_40 = arith.constant 0 : index
      %c0_41 = arith.constant 0 : index
      %61 = vector.load %arg3[%c0_39, %c0_40, %c0_41] : memref<1x64x128xf32, #tpu.memory_space<vmem>>, vector<1x64x128xf32>
      %62 = vector.shape_cast %61 : vector<1x64x128xf32> to vector<64x128xf32>
      %cst_42 = arith.constant dense<0.000000e+00> : vector<1x64xf32>
      %63 = tpu.matmul %60, %62, %cst_42 {dimension_numbers = #tpu.dot_dimension_numbers<[1], [1], [0], [0], [0, 0, 1, 0], [], []>} : vector<1x128xf32>, vector<64x128xf32>, vector<1x64xf32> -> vector<1x64xf32>
      %c0_43 = arith.constant 0 : index
      %c0_44 = arith.constant 0 : index
      %c0_45 = arith.constant 0 : index
      %64 = vector.load %arg2[%c0_43, %c0_44, %c0_45] : memref<1x1x64xf32, #tpu.memory_space<vmem>>, vector<1x1x64xf32>
      %65 = vector.shape_cast %64 : vector<1x1x64xf32> to vector<1x64xf32>
      %66 = arith.addf %63, %65 : vector<1x64xf32>
      %c0_46 = arith.constant 0 : index
      %c0_47 = arith.constant 0 : index
      %c0_48 = arith.constant 0 : index
      %67 = vector.load %arg1[%c0_46, %c0_47, %c0_48] : memref<1x1x64xf32, #tpu.memory_space<vmem>>, vector<1x1x64xf32>
      %68 = vector.shape_cast %67 : vector<1x1x64xf32> to vector<1x64xf32>
      %69 = arith.subf %66, %68 : vector<1x64xf32>
      %cst_49 = arith.constant -1.000000e+00 : f32
      %cst_50 = arith.constant 1.000000e+00 : f32
      %70 = vector.broadcast %cst_49 : f32 to vector<1x64xf32>
      %71 = arith.maximumf %70, %69 : vector<1x64xf32>
      %72 = vector.broadcast %cst_50 : f32 to vector<1x64xf32>
      %73 = arith.minimumf %72, %71 : vector<1x64xf32>
      %cst_51 = arith.constant 7.812500e-03 : f32
      %74 = vector.broadcast %cst_51 : f32 to vector<1x64xf32>
      %75 = arith.mulf %73, %74 : vector<1x64xf32>
      %cst_52 = arith.constant dense<0.000000e+00> : vector<1x128xf32>
      %76 = tpu.matmul %75, %62, %cst_52 {dimension_numbers = #tpu.dot_dimension_numbers<[1], [0], [0], [1], [0, 0, 1, 1], [], []>} : vector<1x64xf32>, vector<64x128xf32>, vector<1x128xf32> -> vector<1x128xf32>
      %cst_53 = arith.constant 0.000000e+00 : f32
      %77 = vector.broadcast %cst_53 : f32 to vector<1x128xf32>
      %78 = arith.subf %77, %60 : vector<1x128xf32>
      %79 = math.exp %78 : vector<1x128xf32>
      %cst_54 = arith.constant 1.000000e+00 : f32
      %80 = vector.broadcast %cst_54 : f32 to vector<1x128xf32>
      %81 = arith.subf %80, %79 : vector<1x128xf32>
      %82 = arith.mulf %76, %81 : vector<1x128xf32>
      %c0_55 = arith.constant 0 : index
      %c0_56 = arith.constant 0 : index
      %83 = vector.load %arg7[%c0_55, %c0_56] : memref<128x128xf32, #tpu.memory_space<vmem>>, vector<128x128xf32>
      %cst_57 = arith.constant dense<0.000000e+00> : vector<1x128xf32>
      %84 = tpu.matmul %82, %83, %cst_57 {dimension_numbers = #tpu.dot_dimension_numbers<[1], [1], [0], [0], [0, 0, 1, 0], [], []>} : vector<1x128xf32>, vector<128x128xf32>, vector<1x128xf32> -> vector<1x128xf32>
      %cst_58 = arith.constant 0.000000e+00 : f32
      %85 = vector.broadcast %cst_58 : f32 to vector<1x128xf32>
      %86 = arith.subf %85, %48 : vector<1x128xf32>
      %87 = math.exp %86 : vector<1x128xf32>
      %cst_59 = arith.constant 1.000000e+00 : f32
      %88 = vector.broadcast %cst_59 : f32 to vector<1x128xf32>
      %89 = arith.subf %88, %87 : vector<1x128xf32>
      %90 = arith.mulf %84, %89 : vector<1x128xf32>
      %c0_60 = arith.constant 0 : index
      %c0_61 = arith.constant 0 : index
      %91 = vector.load %arg5[%c0_60, %c0_61] : memref<8x128xf32, #tpu.memory_space<vmem>>, vector<8x128xf32>
      %cst_62 = arith.constant dense<0.000000e+00> : vector<1x8xf32>
      %92 = tpu.matmul %90, %91, %cst_62 {dimension_numbers = #tpu.dot_dimension_numbers<[1], [1], [0], [0], [0, 0, 1, 0], [], []>} : vector<1x128xf32>, vector<8x128xf32>, vector<1x8xf32> -> vector<1x8xf32>
      %cst_63 = arith.constant 0.899999976 : f32
      %93 = vector.broadcast %cst_63 : f32 to vector<1x8xf32>
      %94 = arith.mulf %93, %arg14 : vector<1x8xf32>
      %cst_64 = arith.constant 1.000000e-01 : f32
      %95 = vector.broadcast %cst_64 : f32 to vector<1x8xf32>
      %96 = arith.mulf %95, %92 : vector<1x8xf32>
      %97 = arith.addf %94, %96 : vector<1x8xf32>
      %cst_65 = arith.constant 9.990000e-01 : f32
      %98 = vector.broadcast %cst_65 : f32 to vector<1x8xf32>
      %99 = arith.mulf %98, %arg15 : vector<1x8xf32>
      %cst_66 = arith.constant 1.000000e-03 : f32
      %100 = vector.broadcast %cst_66 : f32 to vector<1x8xf32>
      %101 = arith.mulf %100, %92 : vector<1x8xf32>
      %102 = arith.mulf %101, %92 : vector<1x8xf32>
      %103 = arith.addf %99, %102 : vector<1x8xf32>
      %cst_67 = arith.constant 0.899999976 : f32
      %104 = vector.broadcast %cst_67 : f32 to vector<1x1xf32>
      %105 = arith.mulf %arg16, %104 : vector<1x1xf32>
      %cst_68 = arith.constant 9.990000e-01 : f32
      %106 = vector.broadcast %cst_68 : f32 to vector<1x1xf32>
      %107 = arith.mulf %arg17, %106 : vector<1x1xf32>
      %cst_69 = arith.constant 1.000000e+00 : f32
      %108 = vector.broadcast %cst_69 : f32 to vector<1x1xf32>
      %109 = arith.subf %108, %105 : vector<1x1xf32>
      %110 = vector.broadcast %109 : vector<1x1xf32> to vector<1x8xf32>
      %111 = arith.divf %97, %110 : vector<1x8xf32>
      %cst_70 = arith.constant 1.000000e+00 : f32
      %112 = vector.broadcast %cst_70 : f32 to vector<1x1xf32>
      %113 = arith.subf %112, %107 : vector<1x1xf32>
      %114 = vector.broadcast %113 : vector<1x1xf32> to vector<1x8xf32>
      %115 = arith.divf %103, %114 : vector<1x8xf32>
      %cst_71 = arith.constant 5.000000e-02 : f32
      %116 = vector.broadcast %cst_71 : f32 to vector<1x8xf32>
      %117 = arith.mulf %116, %111 : vector<1x8xf32>
      %118 = math.sqrt %115 : vector<1x8xf32>
      %cst_72 = arith.constant 9.99999993E-9 : f32
      %119 = vector.broadcast %cst_72 : f32 to vector<1x8xf32>
      %120 = arith.addf %118, %119 : vector<1x8xf32>
      %121 = arith.divf %117, %120 : vector<1x8xf32>
      %122 = arith.subf %arg13, %121 : vector<1x8xf32>
      scf.yield %122, %97, %103, %105, %107 : vector<1x8xf32>, vector<1x8xf32>, vector<1x8xf32>, vector<1x1xf32>, vector<1x1xf32>
    }
    %c0_3 = arith.constant 0 : index
    %c0_4 = arith.constant 0 : index
    %6 = vector.load %arg5[%c0_3, %c0_4] : memref<8x128xf32, #tpu.memory_space<vmem>>, vector<8x128xf32>
    %cst_5 = arith.constant dense<0.000000e+00> : vector<1x128xf32>
    %7 = tpu.matmul %5#0, %6, %cst_5 {dimension_numbers = #tpu.dot_dimension_numbers<[1], [0], [0], [1], [0, 0, 1, 1], [], []>} : vector<1x8xf32>, vector<8x128xf32>, vector<1x128xf32> -> vector<1x128xf32>
    %c0_6 = arith.constant 0 : index
    %c0_7 = arith.constant 0 : index
    %8 = vector.load %arg6[%c0_6, %c0_7] : memref<1x128xf32, #tpu.memory_space<vmem>>, vector<1x128xf32>
    %9 = arith.addf %7, %8 : vector<1x128xf32>
    %cst_8 = arith.constant 0.000000e+00 : f32
    %10 = vector.broadcast %cst_8 : f32 to vector<1x128xf32>
    %11 = arith.maximumf %9, %10 : vector<1x128xf32>
    %12 = math.absf %9 : vector<1x128xf32>
    %cst_9 = arith.constant 0.000000e+00 : f32
    %13 = vector.broadcast %cst_9 : f32 to vector<1x128xf32>
    %14 = arith.subf %13, %12 : vector<1x128xf32>
    %15 = math.exp %14 : vector<1x128xf32>
    %16 = math.log1p %15 : vector<1x128xf32>
    %17 = arith.addf %11, %16 : vector<1x128xf32>
    %c0_10 = arith.constant 0 : index
    %c0_11 = arith.constant 0 : index
    %18 = vector.load %arg7[%c0_10, %c0_11] : memref<128x128xf32, #tpu.memory_space<vmem>>, vector<128x128xf32>
    %cst_12 = arith.constant dense<0.000000e+00> : vector<1x128xf32>
    %19 = tpu.matmul %17, %18, %cst_12 {dimension_numbers = #tpu.dot_dimension_numbers<[1], [0], [0], [1], [0, 0, 1, 1], [], []>} : vector<1x128xf32>, vector<128x128xf32>, vector<1x128xf32> -> vector<1x128xf32>
    %c0_13 = arith.constant 0 : index
    %c0_14 = arith.constant 0 : index
    %20 = vector.load %arg8[%c0_13, %c0_14] : memref<1x128xf32, #tpu.memory_space<vmem>>, vector<1x128xf32>
    %21 = arith.addf %19, %20 : vector<1x128xf32>
    %cst_15 = arith.constant 0.000000e+00 : f32
    %22 = vector.broadcast %cst_15 : f32 to vector<1x128xf32>
    %23 = arith.maximumf %21, %22 : vector<1x128xf32>
    %24 = math.absf %21 : vector<1x128xf32>
    %cst_16 = arith.constant 0.000000e+00 : f32
    %25 = vector.broadcast %cst_16 : f32 to vector<1x128xf32>
    %26 = arith.subf %25, %24 : vector<1x128xf32>
    %27 = math.exp %26 : vector<1x128xf32>
    %28 = math.log1p %27 : vector<1x128xf32>
    %29 = arith.addf %23, %28 : vector<1x128xf32>
    %c0_17 = arith.constant 0 : index
    %c0_18 = arith.constant 0 : index
    %30 = vector.load %arg9[%c0_17, %c0_18] : memref<128x256xf32, #tpu.memory_space<vmem>>, vector<128x256xf32>
    %cst_19 = arith.constant dense<0.000000e+00> : vector<1x256xf32>
    %31 = tpu.matmul %29, %30, %cst_19 {dimension_numbers = #tpu.dot_dimension_numbers<[1], [0], [0], [1], [0, 0, 1, 1], [], []>} : vector<1x128xf32>, vector<128x256xf32>, vector<1x256xf32> -> vector<1x256xf32>
    %c0_20 = arith.constant 0 : index
    %c0_21 = arith.constant 0 : index
    %32 = vector.load %arg10[%c0_20, %c0_21] : memref<1x256xf32, #tpu.memory_space<vmem>>, vector<1x256xf32>
    %33 = arith.addf %31, %32 : vector<1x256xf32>
    %c0_22 = arith.constant 0 : index
    %c0_23 = arith.constant 0 : index
    %c0_24 = arith.constant 0 : index
    %34 = vector.load %arg11[%c0_22, %c0_23, %c0_24] : memref<1x1x256xf32, #tpu.memory_space<vmem>>, vector<1x1x256xf32>
    %35 = vector.shape_cast %34 : vector<1x1x256xf32> to vector<1x256xf32>
    %36 = vector.shape_cast %33 : vector<1x256xf32> to vector<1x1x256xf32>
    tpu.vector_store %arg11[%c0_22, %c0_23, %c0_24], %36 {strides = array<i32>} : memref<1x1x256xf32, #tpu.memory_space<vmem>>, vector<1x1x256xf32>,
    return
  }
  func.func @transform_0(%arg0: i32) -> (i32, i32, i32) {
    %c0_i32 = arith.constant 0 : i32
    %c0_i32_0 = arith.constant 0 : i32
    %c0_i32_1 = arith.constant 0 : i32
    return %arg0, %c0_i32, %c0_i32_0 : i32, i32, i32
  }
  func.func @transform_1(%arg0: i32) -> (i32, i32, i32) {
    %c0_i32 = arith.constant 0 : i32
    %c0_i32_0 = arith.constant 0 : i32
    %c0_i32_1 = arith.constant 0 : i32
    return %arg0, %c0_i32, %c0_i32_0 : i32, i32, i32
  }
  func.func @transform_2(%arg0: i32) -> (i32, i32, i32) {
    %c0_i32 = arith.constant 0 : i32
    %c0_i32_0 = arith.constant 0 : i32
    %c0_i32_1 = arith.constant 0 : i32
    return %arg0, %c0_i32, %c0_i32_0 : i32, i32, i32
  }
  func.func @transform_3(%arg0: i32) -> (i32, i32, i32) {
    %c0_i32 = arith.constant 0 : i32
    %c0_i32_0 = arith.constant 0 : i32
    %c0_i32_1 = arith.constant 0 : i32
    return %arg0, %c0_i32, %c0_i32_0 : i32, i32, i32
  }
  func.func @transform_4(%arg0: i32) -> (i32, i32) {
    %c0_i32 = arith.constant 0 : i32
    %c0_i32_0 = arith.constant 0 : i32
    %c0_i32_1 = arith.constant 0 : i32
    return %c0_i32, %c0_i32_0 : i32, i32
  }
  func.func @transform_5(%arg0: i32) -> (i32, i32) {
    %c0_i32 = arith.constant 0 : i32
    %c0_i32_0 = arith.constant 0 : i32
    %c0_i32_1 = arith.constant 0 : i32
    return %c0_i32, %c0_i32_0 : i32, i32
  }
  func.func @transform_6(%arg0: i32) -> (i32, i32) {
    %c0_i32 = arith.constant 0 : i32
    %c0_i32_0 = arith.constant 0 : i32
    %c0_i32_1 = arith.constant 0 : i32
    return %c0_i32, %c0_i32_0 : i32, i32
  }
  func.func @transform_7(%arg0: i32) -> (i32, i32) {
    %c0_i32 = arith.constant 0 : i32
    %c0_i32_0 = arith.constant 0 : i32
    %c0_i32_1 = arith.constant 0 : i32
    return %c0_i32, %c0_i32_0 : i32, i32
  }
  func.func @transform_8(%arg0: i32) -> (i32, i32) {
    %c0_i32 = arith.constant 0 : i32
    %c0_i32_0 = arith.constant 0 : i32
    %c0_i32_1 = arith.constant 0 : i32
    return %c0_i32, %c0_i32_0 : i32, i32
  }
  func.func @transform_9(%arg0: i32) -> (i32, i32) {
    %c0_i32 = arith.constant 0 : i32
    %c0_i32_0 = arith.constant 0 : i32
    %c0_i32_1 = arith.constant 0 : i32
    return %c0_i32, %c0_i32_0 : i32, i32
  }
  func.func @transform_10(%arg0: i32) -> (i32, i32, i32) {
    %c0_i32 = arith.constant 0 : i32
    %c0_i32_0 = arith.constant 0 : i32
    %c0_i32_1 = arith.constant 0 : i32
    return %arg0, %c0_i32, %c0_i32_0 : i32, i32, i32
  }
}

</mosaic_0001>

<bundles_post_ra>
// kernel: model_forward.1
= control target key start
LH: loop header
LB: loop body
LE: loop exit
PB: predicated region body
PF: predicated region fallthrough
CT: control target
= control target key end

     0   :  { %s1956_s13 = smov 0   ;;  %s2322_s0 = inlined_call_operand.vmem [shape: f32[2,1,64], index: 0, kind: input, shape index: {}]   ;;  %s2323_s1 = inlined_call_operand.vmem [shape: f32[2,1,64], index: 1, kind: input, shape index: {}]   ;;  %s2324_s2 = inlined_call_operand.vmem [shape: f32[2,64,128], index: 2, kind: input, shape index: {}]   ;;  %s2325_s3 = inlined_call_operand.vmem [shape: f32[2,1,8], index: 3, kind: input, shape index: {}]   ;;  %s2326_s4 = inlined_call_operand.vmem [shape: f32[8,128], index: 4, kind: input, shape index: {}]   ;;  %s2327_s5 = inlined_call_operand.vmem [shape: f32[1,128], index: 5, kind: input, shape index: {}]   ;;  %s2328_s6 = inlined_call_operand.vmem [shape: f32[128,128], index: 6, kind: input, shape index: {}]   ;;  %s2329_s7 = inlined_call_operand.vmem [shape: f32[1,128], index: 7, kind: input, shape index: {}]   ;;  %s2330_s8 = inlined_call_operand.vmem [shape: f32[128,256], index: 8, kind: input, shape index: {}]   ;;  %s2331_s9 = inlined_call_operand.vmem [shape: f32[1,256], index: 9, kind: input, shape index: {}]   ;;  %s2332_s10 = inlined_call_operand.vmem [shape: f32[2,1,256], index: 10, kind: output, shape index: {}]  }
   0x1 LB: > { %s1371_s14 = sadd.s32 4294967295, %s1868_s13   ;;  %p1375_p0 = scmp.ge.s32.totalorder %s1868_s13, 1  ;;  %s1868_s13 = sphi %s1956_s13, %s20_s13  }
   0x2   : > { %p336_p1 = scmp.lt.s32.totalorder %s1868_s13, 3 }
   0x4   : > { %p337_p2 = pnand %p1375_p0, %p336_p1 }
   0x5   : > { %p382_p3 = scmp.lt.s32.totalorder (!%p337_p2), %s1371_s14, 1  ;;  %v1990_v1 = vmov (!%p337_p2), 1.0   ;;  %v1992_v2 = vmov (!%p337_p2), 1.0   ;;  %v1994_v3 = vmov (!%p337_p2), 0.0   ;;  %v1996_v4 = vmov (!%p337_p2), 0.0   ;;  %s2000_s12 = smov (!%p337_p2), 0  }
   0x6   : > { %340 = sbr.rel (%p337_p2) target bundleno = 2142 (0x85e), region = 60 }
   0xd   : > { %s2335_s14 = smov (!%p382_p3, %s1371_s14), 1 }
   0xe   : > { %s384_s17 = scalar_lea.vmem %s2322_s0, %s2335_s14  ;;  %s387_s20 = scalar_lea.vmem %s2323_s1, %s2335_s14 }
   0xf   : > { %s1385_s21 = sshll.u32 %s2335_s14, 6  ;;  %s395_s24 = scalar_lea.vmem %s2325_s3, %s2335_s14 }
  0x10   : > { %s1982_s27 = scalar_lea.vmem %s2324_s2, %s1385_s21  ;;  %s1378_s28 = sshll.u32 %s2335_s14, 1  ;;  %v400_v0 = vld [vmem:[%s395_s24] sm:$0x1]  }
  0x11   : > { %s1988_s11 = scalar_lea.vmem %s2332_s10, %s1378_s28 }
  0x12 LB: >> { %v2023_v5 = vld [vmem:[%s2326_s4] sm:$0xff]  ;;  %vm414_vm0 = vcmask 64512   ;;  %v1894_v6 = vmov 0.0   ;;  %vm1895_vm1 = vmmov 0   ;;  %v504_v8 = vld [vmem:[%s2328_s6 + $0x8] sm:$0xff]  ;;  %v1896_v10 = vmov 0.0|0.0   ;;  %s1892_s12 = sphi %s2000_s12, %s406_s12   ;;  %v1888_v0 = vphi %v400_v0, %v2333_v0   ;;  %v1884_v4 = vphi %v1996_v4, %v915_v4   ;;  %v1880_v3 = vphi %v1994_v3, %v919_v3   ;;  %v1876_v2 = vphi %v1992_v2, %v920_v2   ;;  %v1872_v1 = vphi %v1990_v1, %v921_v1  }
  0x13   : >> { %1461 = vmatprep.subr.mxu0 %v1894_v6  ;;  %1463 = vmatprep.mubr.msk.f32.mxu0 %vm1895_vm1, %v1894_v6  ;;  %v503_v7 = vld [vmem:[%s2328_s6] sm:$0xff]  ;;  %v505_v11 = vld [vmem:[%s2328_s6 + $0x10] sm:$0xff]  ;;  %v506_v12 = vld [vmem:[%s2328_s6 + $0x18] sm:$0xff]  ;;  %vm689_vm4 = vcmask 523264   ;;  %v921_v1 = vmul.f32 0.999, %v1872_v1  }
  0x14   : >> { %1462 = vmatpush3.msra.mxu0 %v2023_v5  ;;  %1498 = vmatprep.mubr.msk.f32.mxu1 %vm1895_vm1, %v1894_v6  ;;  %v1620_v9 = vpack.c.bf16 %v504_v8, %v503_v7  ;;  %v1623_v13 = vpack.c.bf16 %v506_v12, %v505_v11  ;;  %v507_v14 = vld [vmem:[%s2328_s6 + $0x20] sm:$0xff]  ;;  %v508_v15 = vld [vmem:[%s2328_s6 + $0x28] sm:$0xff]  ;;  %v509_v17 = vld [vmem:[%s2328_s6 + $0x30] sm:$0xff]  ;;  %v920_v2 = vmul.f32 0.9, %v1876_v2   ;;  %s406_s12 = sadd.s32 1, %s1892_s12  }
  0x15   : >> { %1464 = vmatmul.mubr.msk.f32.vlgmr.msra.gmra.mrb[0].mxu0 %vm414_vm0, %v1888_v0  ;;  %1619 = vmatprep.subr.bf16.mxu1 %v1896_v10  ;;  %v1626_v16 = vpack.c.bf16 %v508_v15, %v507_v14  ;;  %v510_v18 = vld [vmem:[%s2328_s6 + $0x38] sm:$0xff]  ;;  %v511_v20 = vld [vmem:[%s2328_s6 + $0x40] sm:$0xff]  ;;  %v512_v21 = vld [vmem:[%s2328_s6 + $0x48] sm:$0xff]  ;;  %p403_p4 = scmp.ge.s32.totalorder %s406_s12, 8  }
  0x16   : >> { %1571 = vmatprep.mubr.msk.f32.mxu0 %vm1895_vm1, %v1894_v6  ;;  %1667 = vmatprep.subr.bf16.mxu0 %v1896_v10  ;;  %v1629_v19 = vpack.c.bf16 %v510_v18, %v509_v17  ;;  %v1632_v22 = vpack.c.bf16 %v512_v21, %v511_v20  ;;  %v513_v23 = vld [vmem:[%s2328_s6 + $0x50] sm:$0xff]  ;;  %v514_v24 = vld [vmem:[%s2328_s6 + $0x58] sm:$0xff]  ;;  %v515_v26 = vld [vmem:[%s2328_s6 + $0x60] sm:$0xff]  ;;  %vm1898_vm7 = vmmov (%p403_p4), 0  }
  0x17   : >> { %1621 = vmatpush3.bf16.msra.mxu1 %v1620_v9  ;;  %v1635_v25 = vpack.c.bf16 %v514_v24, %v513_v23  ;;  %v516_v27 = vld [vmem:[%s2328_s6 + $0x68] sm:$0xff]  ;;  %v517_v29 = vld [vmem:[%s2328_s6 + $0x70] sm:$0xff]  ;;  %v518_v30 = vld [vmem:[%s2328_s6 + $0x78] sm:$0xff] }
  0x18   : >> { %1622 = vmatprep.subr.bf16.mxu1 %v1896_v10  ;;  %v1638_v28 = vpack.c.bf16 %v516_v27, %v515_v26  ;;  %v1641_v31 = vpack.c.bf16 %v518_v30, %v517_v29  ;;  %v413_v32 = vld [vmem:[%s2327_s5] sm:$0x1]  ;;  %v606_v51 = vld [vmem:[%s1982_s27 + $0x8] sm:$0xff]  ;;  %v607_v53 = vld [vmem:[%s1982_s27 + $0x10] sm:$0xff] }
  0x19   : >> { %v605_v50 = vld [vmem:[%s1982_s27] sm:$0xff]  ;;  %v608_v54 = vld [vmem:[%s1982_s27 + $0x18] sm:$0xff]  ;;  %v610_v57 = vld [vmem:[%s1982_s27 + $0x28] sm:$0xff] }
  0x1a   : >> { %v1644_v52 = vpack.c.bf16 %v606_v51, %v605_v50  ;;  %v1647_v55 = vpack.c.bf16 %v608_v54, %v607_v53  ;;  %v609_v56 = vld [vmem:[%s1982_s27 + $0x20] sm:$0xff]  ;;  %v611_v59 = vld [vmem:[%s1982_s27 + $0x30] sm:$0xff]  ;;  %v612_v60 = vld [vmem:[%s1982_s27 + $0x38] sm:$0xff]  ;;  %v922_v51 = vsub.f32 1.0, %v920_v2 }
  0x1b   : >> { %1669 = vmatpush3.bf16.xpose.msra.mxu0 %v1620_v9  ;;  %1624 = vmatpush3.bf16.msra.mxu1 %v1623_v13  ;;  %v1650_v58 = vpack.c.bf16 %v610_v57, %v609_v56  ;;  %v1653_v61 = vpack.c.bf16 %v612_v60, %v611_v59  ;;  %v519_v62 = vld [vmem:[%s2329_s7] sm:$0x1]  ;;  %v913_v56 = vmul.f32 0.9, %v1884_v4 }
  0x1c   : >> { %1670 = vmatprep.subr.bf16.mxu0 %v1896_v10  ;;  %1625 = vmatprep.subr.bf16.mxu1 %v1896_v10  ;;  %v613_v24 = vld [vmem:[%s387_s20] sm:$0x1] }
  0x1d   : >> { %v684_v26 = vld [vmem:[%s384_s17] sm:$0x1] }
  0x1f   : >> { %1627 = vmatpush3.bf16.msra.mxu1 %v1626_v16 }
  0x20   : >> { %1628 = vmatprep.subr.bf16.mxu1 %v1896_v10 }
  0x23   : >> { %1672 = vmatpush3.bf16.xpose.msra.mxu0 %v1623_v13  ;;  %1630 = vmatpush3.bf16.msra.mxu1 %v1629_v19 }
  0x24   : >> { %1673 = vmatprep.subr.bf16.mxu0 %v1896_v10  ;;  %1631 = vmatprep.subr.bf16.mxu1 %v1896_v10 }
  0x27   : >> { %1633 = vmatpush3.bf16.msra.mxu1 %v1632_v22 }
  0x28   : >> { %1634 = vmatprep.subr.bf16.mxu1 %v1896_v10 }
  0x2b   : >> { %1675 = vmatpush3.bf16.xpose.msra.mxu0 %v1626_v16  ;;  %1636 = vmatpush3.bf16.msra.mxu1 %v1635_v25 }
  0x2c   : >> { %1676 = vmatprep.subr.bf16.mxu0 %v1896_v10  ;;  %1637 = vmatprep.subr.bf16.mxu1 %v1896_v10 }
  0x2f   : >> { %1639 = vmatpush3.bf16.msra.mxu1 %v1638_v28 }
  0x30   : >> { %1640 = vmatprep.subr.bf16.mxu1 %v1896_v10 }
  0x33   : >> { %1678 = vmatpush3.bf16.xpose.msra.mxu0 %v1629_v19  ;;  %1642 = vmatpush3.bf16.msra.mxu1 %v1641_v31 }
  0x34   : >> { %1679 = vmatprep.subr.bf16.mxu0 %v1896_v10  ;;  %1643 = vmatprep.subr.bf16.mxu1 %v1896_v10 }
  0x3b   : >> { %1681 = vmatpush3.bf16.xpose.msra.mxu0 %v1632_v22 }
  0x3c   : >> { %1682 = vmatprep.subr.bf16.mxu0 %v1896_v10 }
  0x43   : >> { %1684 = vmatpush3.bf16.xpose.msra.mxu0 %v1635_v25 }
  0x44   : >> { %1685 = vmatprep.subr.bf16.mxu0 %v1896_v10 }
  0x4b   : >> { %1687 = vmatpush3.bf16.xpose.msra.mxu0 %v1638_v28 }
  0x4c   : >> { %1688 = vmatprep.subr.bf16.mxu0 %v1896_v10 }
  0x53   : >> { %1690 = vmatpush3.bf16.xpose.msra.mxu0 %v1641_v31 }
  0x54   : >> { %1574 = vmatprep.subr.mxu0 %v1894_v6 }
  0xe8   : >> { %v484_v33 = vpop.f32.mrb[0].mxu0 }
  0xe9   : >> { %v485_v34 = vadd.f32 %v484_v33, %v413_v32  ;;  %v1465_v35 = vpop.f32.mrb[1].mxu0 }
  0xeb   : >> { %v489_v36 = vand.u32 2147483647, %v485_v34  ;;  %v488_v47 = vmax.f32 %v485_v34, 0.0 }
  0xed   : >> { %v490_v37 = vsub.f32 0.0, %v489_v36 }
  0xef   : >> { %v491_v38 = vmul.f32 1.442695, %v490_v37 }
  0xf1   : >> { %1810 = vpow2.f32 %v491_v38 }
  0xfb   : >> { %v1811_v39 = vpop.eup %1810 }
  0xfc   : >> { %v493_v40 = vadd.f32 1.0, %v1811_v39  ;;  %v496_v41 = vmul.f32 -0.5, %v1811_v39  ;;  %v499_v43 = vand.u32 2147483647, %v1811_v39 }
  0xfe   : >> { %1812 = vlog2.f32 %v493_v40  ;;  %v497_v42 = vadd.f32 1.0, %v496_v41  ;;  %vm500_vm2 = vcmp.lt.f32.partialorder %v499_v43, 0.0004427343 }
 0x100   : >> { %v498_v46 = vmul.f32 %v1811_v39, %v497_v42 }
 0x108   : >> { %v1813_v44 = vpop.eup %1812 }
 0x109   : >> { %v495_v45 = vmul.f32 0.6931472, %v1813_v44 }
 0x10b   : >> { %v501_v48 = vsel %vm500_vm2, %v498_v46, %v495_v45  ;;  %v925_v45 = vsub.f32 1.0, %v921_v1  ;;  %v1032_v1 = vld [vmem:[%s2328_s6 + $0x8] sm:$0xff] (%p403_p4) }
 0x10c   : >> { %v2104_v49 = vadd.f32 %v501_v48, %v488_v47 }
 0x10e   : >> { %1499 = vmatmul.mubr.f32.vlgmr.msra.gmra.mrb[0].mxu1 %v2104_v49  ;;  %v838_v38 = vsub.f32 0.0, %v2104_v49 }
 0x10f   : >> { %1517 = vmatprep.mubr.msk.f32.mxu1 %vm1895_vm1, %v1894_v6  ;;  %1645 = vmatpush3.bf16.xpose.msra.mxu1 %v1644_v52 }
 0x110   : >> { %1646 = vmatprep.subr.bf16.mxu1 %v1896_v10  ;;  %v839_v39 = vmul.f32 1.442695, %v838_v38 }
 0x117   : >> { %1648 = vmatpush3.bf16.xpose.msra.mxu1 %v1647_v55 }
 0x118   : >> { %1649 = vmatprep.subr.bf16.mxu1 %v1896_v10 }
 0x11f   : >> { %1651 = vmatpush3.bf16.xpose.msra.mxu1 %v1650_v58 }
 0x120   : >> { %1652 = vmatprep.subr.bf16.mxu1 %v1896_v10 }
 0x127   : >> { %1654 = vmatpush3.bf16.xpose.msra.mxu1 %v1653_v61 }
 0x128   : >> { %1655 = vmatprep.subr.bf16.mxu1 %v1896_v10 }
 0x1e1   : >> { %v586_v63 = vpop.f32.mrb[0].mxu1 }
 0x1e2   : >> { %v587_v7 = vadd.f32 %v586_v63, %v519_v62  ;;  %v1500_v8 = vpop.f32.mrb[1].mxu1 }
 0x1e4   : >> { %v591_v9 = vand.u32 2147483647, %v587_v7  ;;  %v590_v21 = vmax.f32 %v587_v7, 0.0 }
 0x1e6   : >> { %v592_v11 = vsub.f32 0.0, %v591_v9  ;;  %v1897_v9 = vmov (%p403_p4), 0.0  }
 0x1e8   : >> { %v593_v12 = vmul.f32 1.442695, %v592_v11  ;;  %v1031_v11 = vld [vmem:[%s2328_s6] sm:$0xff] (%p403_p4) }
 0x1e9   : > { %v1692_v2 = vpack.c.bf16 (%p403_p4), %v1032_v1, %v1031_v11  ;;  %v1145_v11 = vld [vmem:[%s2330_s8 + $0x60] sm:$0xff] (%p403_p4)  ;;  %v1147_v1 = vld [vmem:[%s2330_s8 + $0x70] sm:$0xff] (%p403_p4) }
 0x1ea   : >> { %1814 = vpow2.f32 %v593_v12  ;;  %v1034_v12 = vld [vmem:[%s2328_s6 + $0x18] sm:$0xff] (%p403_p4) }
 0x1f4   : >> { %v1815_v13 = vpop.eup %1814 }
 0x1f5   : >> { %v595_v14 = vadd.f32 1.0, %v1815_v13  ;;  %v598_v15 = vmul.f32 -0.5, %v1815_v13  ;;  %v601_v17 = vand.u32 2147483647, %v1815_v13 }
 0x1f7   : >> { %1816 = vlog2.f32 %v595_v14  ;;  %v599_v16 = vadd.f32 1.0, %v598_v15  ;;  %vm602_vm3 = vcmp.lt.f32.partialorder %v601_v17, 0.0004427343  ;;  %v1035_v14 = vld [vmem:[%s2328_s6 + $0x20] sm:$0xff] (%p403_p4)  ;;  %v1036_v15 = vld [vmem:[%s2328_s6 + $0x28] sm:$0xff] (%p403_p4)  ;;  %v1037_v17 = vld [vmem:[%s2328_s6 + $0x30] sm:$0xff] (%p403_p4) }
 0x1f9   : >> { %v600_v20 = vmul.f32 %v1815_v13, %v599_v16  ;;  %v1698_v16 = vpack.c.bf16 (%p403_p4), %v1036_v15, %v1035_v14  ;;  %v1151_v14 = vld [vmem:[%s2330_s8 + $0x90] sm:$0xff] (%p403_p4) }
 0x201   : >> { %v1817_v18 = vpop.eup %1816 }
 0x202   : >> { %v597_v19 = vmul.f32 0.6931472, %v1817_v18  ;;  %v1038_v18 = vld [vmem:[%s2328_s6 + $0x38] sm:$0xff] (%p403_p4) }
 0x204   : >> { %v603_v22 = vsel %vm602_vm3, %v600_v20, %v597_v19  ;;  %v1701_v19 = vpack.c.bf16 (%p403_p4), %v1038_v18, %v1037_v17  ;;  %v1039_v20 = vld [vmem:[%s2328_s6 + $0x40] sm:$0xff] (%p403_p4)  ;;  %v1156_v17 = vld [vmem:[%s2330_s8 + $0xb8] sm:$0xff] (%p403_p4) }
 0x205   : >> { %v604_v23 = vadd.f32 %v603_v22, %v590_v21  ;;  %v1040_v21 = vld [vmem:[%s2328_s6 + $0x48] sm:$0xff] (%p403_p4) }
 0x206   : > { %v1704_v22 = vpack.c.bf16 (%p403_p4), %v1040_v21, %v1039_v20  ;;  %v1155_v20 = vld [vmem:[%s2330_s8 + $0xb0] sm:$0xff] (%p403_p4) }
 0x207   : >> { %1518 = vmatmul.mubr.f32.vlgmr.msra.gmra.mrb[2].mxu1 %v604_v23 }
 0x208   : >> { %1657 = vmatpush3.bf16.msra.mxu1 %v1644_v52  ;;  %1536 = vmatprep.mubr.msk.f32.mxu1 %vm1895_vm1, %v1894_v6 }
 0x209   : >> { %1658 = vmatprep.subr.bf16.mxu1 %v1896_v10 }
 0x20c   : >> { %1660 = vmatpush3.bf16.msra.mxu1 %v1647_v55 }
 0x20d   : >> { %1661 = vmatprep.subr.bf16.mxu1 %v1896_v10 }
 0x210   : >> { %1663 = vmatpush3.bf16.msra.mxu1 %v1650_v58 }
 0x211   : >> { %1664 = vmatprep.subr.bf16.mxu1 %v1896_v10  ;;  %v763_v10 = vsub.f32 0.0, %v604_v23  ;;  %v1041_v23 = vld [vmem:[%s2328_s6 + $0x50] sm:$0xff] (%p403_p4) }
 0x213   : >> { %v764_v32 = vmul.f32 1.442695, %v763_v10  ;;  %v941_v10 = vld [vmem:[%s2327_s5] sm:$0x1] (%p403_p4) }
 0x214   : >> { %1666 = vmatpush3.bf16.msra.mxu1 %v1653_v61 }
 0x215   : >> { %1818 = vpow2.f32 %v764_v32 }
 0x216   : >> { %1820 = vpow2.f32 %v839_v39 }
 0x217   : >> { %1822 = vrcp.f32 %v925_v45 }
 0x21f   : >> { %v1819_v33 = vpop.eup %1818 }
 0x220   : >> { %v766_v34 = vsub.f32 1.0, %v1819_v33  ;;  %v1821_v40 = vpop.eup %1820 }
 0x221   : >> { %v841_v41 = vsub.f32 1.0, %v1821_v40  ;;  %v1823_v50 = vpop.eup %1822 }
 0x2da   : >> { %v680_v25 = vpop.f32.mrb[2].mxu1 }
 0x2db   : >> { %v681_v27 = vadd.f32 %v680_v25, %v613_v24  ;;  %v1519_v28 = vpop.f32.mrb[3].mxu1  ;;  %v1042_v24 = vld [vmem:[%s2328_s6 + $0x58] sm:$0xff] (%p403_p4) }
 0x2dc   : > { %v1707_v25 = vpack.c.bf16 (%p403_p4), %v1042_v24, %v1041_v23  ;;  %v1160_v23 = vld [vmem:[%s2330_s8 + $0xd8] sm:$0xff] (%p403_p4) }
 0x2dd   : >> { %v685_v29 = vsub.f32 %v681_v27, %v684_v26  ;;  %v1043_v26 = vld [vmem:[%s2328_s6 + $0x60] sm:$0xff] (%p403_p4)  ;;  %v1044_v27 = vld [vmem:[%s2328_s6 + $0x68] sm:$0xff] (%p403_p4) }
 0x2de   : > { %v1710_v28 = vpack.c.bf16 (%p403_p4), %v1044_v27, %v1043_v26  ;;  %v1159_v26 = vld [vmem:[%s2330_s8 + $0xd0] sm:$0xff] (%p403_p4) }
 0x2df   : >> { %v1380_v30 = vclamps-f32 %v685_v29, 1.0  ;;  %v1045_v29 = vld [vmem:[%s2328_s6 + $0x70] sm:$0xff] (%p403_p4) }
 0x2e1   : >> { %v688_v31 = vmul.f32 0.0078125, %v1380_v30  ;;  %v1046_v30 = vld [vmem:[%s2328_s6 + $0x78] sm:$0xff] (%p403_p4) }
 0x2e3   : >> { %1537 = vmatmul.mubr.msk.f32.vlgmr.msra.gmra.mrb[4].mxu1 %vm689_vm4, %v688_v31  ;;  %v1713_v31 = vpack.c.bf16 (%p403_p4), %v1046_v30, %v1045_v29  ;;  %v1164_v29 = vld [vmem:[%s2330_s8 + $0xf8] sm:$0xff] (%p403_p4) }
 0x2e4   : > { %1616 = vmatprep.mubr.msk.f32.mxu1 (%p403_p4), %vm1898_vm7, %v1897_v9 }
 0x3b6   : >> { %v759_v35 = vpop.f32.mrb[4].mxu1 }
 0x3b7   : >> { %v767_v36 = vmul.f32 %v766_v34, %v759_v35  ;;  %v1538_v37 = vpop.f32.mrb[5].mxu1 }
 0x3b9   : >> { %1572 = vmatmul.mubr.f32.vlgmr.msra.gmra.mrb[2].mxu0 %v767_v36 }
 0x3ba   : >> { %1575 = vmatpush3.xpose.msra.mxu0 %v2023_v5  ;;  %1576 = vmatprep.mubr.msk.f32.mxu0 %vm1895_vm1, %v1894_v6  ;;  %v916_v5 = vmul.f32 0.999, %v1880_v3 }
 0x3bb   : > { %1579 = vmatprep.subr.mxu0 (%p403_p4), %v1897_v9 }
 0x48c   : >> { %v834_v42 = vpop.f32.mrb[2].mxu0 }
 0x48d   : >> { %v842_v43 = vmul.f32 %v841_v41, %v834_v42  ;;  %v1573_v44 = vpop.f32.mrb[3].mxu0 }
 0x48f   : >> { %1577 = vmatmul.mubr.f32.vlgmr.msra.gmra.mrb[4].mxu0 %v842_v43 }
 0x490   : > { %1581 = vmatprep.mubr.msk.f32.mxu0 (%p403_p4), %vm1898_vm7, %v1897_v9 }
 0x562   : >> { %v909_v46 = vpop.f32.mrb[4].mxu0 }
 0x563   : >> { %v917_v47 = vmul.f32 0.001, %v909_v46  ;;  %v1578_v48 = vpop.f32.mrb[5].mxu0  ;;  %v914_v57 = vmul.f32 0.1, %v909_v46 }
 0x564   : > { %v1134_v48 = vld [vmem:[%s2330_s8 + $0x8] sm:$0xff] (%p403_p4) }
 0x565   : >> { %v918_v6 = vmul.f32 %v917_v47, %v909_v46  ;;  %v915_v4 = vadd.f32 %v914_v57, %v913_v56   ;;  %v1137_v56 = vld [vmem:[%s2330_s8 + $0x20] sm:$0xff] (%p403_p4)  ;;  %v1139_v57 = vld [vmem:[%s2330_s8 + $0x30] sm:$0xff] (%p403_p4) }
 0x567   : >> { %v919_v3 = vadd.f32 %v918_v6, %v916_v5   ;;  %v1136_v6 = vld [vmem:[%s2330_s8 + $0x18] sm:$0xff] (%p403_p4) }
 0x569   : >> { %v927_v49 = vmul.f32 %v1823_v50, %v919_v3  ;;  %v1899_v3 = vmov (%p403_p4), 0.0|0.0   ;;  %v1715_v50 = vpack.c.bf16 (%p403_p4), %v1136_v6, %v1134_v48 }
 0x56a   : > { %1691 = vmatprep.subr.bf16.mxu1 (%p403_p4), %v1899_v3 }
 0x56b   : >> { %1824 = vrsqrt.f32 %v927_v49  ;;  %vm931_vm5 = vcmp.eq.f32.partialorder %v927_v49, inf  ;;  %v934_v54 = vand.u32 2147483648, %v927_v49  ;;  %vm933_vm6 = vcmp.eq.f32.partialorder %v927_v49, 0.0  ;;  %1693 = vmatpush3.bf16.msra.mxu1 (%p403_p4), %v1692_v2 }
 0x56c   : >> { %1826 = vrcp.f32 %v922_v51  ;;  %1694 = vmatprep.subr.bf16.mxu1 (%p403_p4), %v1899_v3  ;;  %v1135_v51 = vld [vmem:[%s2330_s8 + $0x10] sm:$0xff] (%p403_p4)  ;;  %v1729_v2 = vpack.c.bf16 (%p403_p4), %v1147_v1, %v1145_v11 }
 0x575   : >> { %v1825_v52 = vpop.eup %1824 }
 0x576   : >> { %v930_v53 = vmul.f32 %v1825_v52, %v927_v49  ;;  %v1827_v60 = vpop.eup %1826 }
 0x577   : >> { %v924_v61 = vmul.f32 %v1827_v60, %v915_v4  ;;  %v1033_v4 = vld [vmem:[%s2328_s6 + $0x10] sm:$0xff] (%p403_p4)  ;;  %v1144_v60 = vld [vmem:[%s2330_s8 + $0x58] sm:$0xff] (%p403_p4) }
 0x578   : >> { %v932_v55 = vsel %vm931_vm5, %v927_v49, %v930_v53  ;;  %v1695_v13 = vpack.c.bf16 (%p403_p4), %v1034_v12, %v1033_v4  ;;  %v1133_v49 = vld [vmem:[%s2330_s8] sm:$0xff] (%p403_p4)  ;;  %v1138_v53 = vld [vmem:[%s2330_s8 + $0x28] sm:$0xff] (%p403_p4)  ;;  %v1152_v4 = vld [vmem:[%s2330_s8 + $0x98] sm:$0xff] (%p403_p4) }
 0x579   : >> { %v935_v58 = vsel %vm933_vm6, %v934_v54, %v932_v55  ;;  %v928_v62 = vmul.f32 0.05, %v924_v61  ;;  %v1717_v52 = vpack.c.bf16 (%p403_p4), %v1135_v51, %v1133_v49  ;;  %v1140_v54 = vld [vmem:[%s2330_s8 + $0x38] sm:$0xff] (%p403_p4) }
 0x57a   : >> { %v936_v59 = vadd.f32 1e-08, %v935_v58  ;;  %1696 = vmatpush3.bf16.msra.mxu1 (%p403_p4), %v1695_v13  ;;  %v1719_v55 = vpack.c.bf16 (%p403_p4), %v1140_v54, %v1138_v53  ;;  %v1721_v58 = vpack.c.bf16 (%p403_p4), %v1139_v57, %v1137_v56  ;;  %v1149_v13 = vld [vmem:[%s2330_s8 + $0x80] sm:$0xff] (%p403_p4)  ;;  %v1900_v54 = vmov (%p403_p4), 1966171168  }
 0x57b   : > { %1697 = vmatprep.subr.bf16.mxu1 (%p403_p4), %v1899_v3  ;;  %v1733_v15 = vpack.c.bf16 (%p403_p4), %v1151_v14, %v1149_v13 }
 0x57c   : >> { %1828 = vrcp.f32 %v936_v59  ;;  %v1142_v59 = vld [vmem:[%s2330_s8 + $0x48] sm:$0xff] (%p403_p4) }
 0x57d   : > { %v1723_v61 = vpack.c.bf16 (%p403_p4), %v1144_v60, %v1142_v59 }
 0x57e   : > { %1699 = vmatpush3.bf16.msra.mxu1 (%p403_p4), %v1698_v16  ;;  %v1154_v16 = vld [vmem:[%s2330_s8 + $0xa8] sm:$0xff] (%p403_p4) }
 0x57f   : > { %1700 = vmatprep.subr.bf16.mxu1 (%p403_p4), %v1899_v3  ;;  %v1735_v18 = vpack.c.bf16 (%p403_p4), %v1156_v17, %v1154_v16 }
 0x582   : > { %1702 = vmatpush3.bf16.msra.mxu1 (%p403_p4), %v1701_v19  ;;  %v1153_v19 = vld [vmem:[%s2330_s8 + $0xa0] sm:$0xff] (%p403_p4) }
 0x583   : > { %1703 = vmatprep.subr.bf16.mxu1 (%p403_p4), %v1899_v3  ;;  %v1737_v21 = vpack.c.bf16 (%p403_p4), %v1155_v20, %v1153_v19 }
 0x585   : > { %405 = sbr.rel (!%p403_p4) target bundleno = 18 (0x12), region = 106 }
 0x586   : >> { %v1829_v63 = vpop.eup %1828  ;;  %1705 = vmatpush3.bf16.msra.mxu1 (%p403_p4), %v1704_v22  ;;  %v1158_v22 = vld [vmem:[%s2330_s8 + $0xc8] sm:$0xff] (%p403_p4) }
 0x587   : >> { %v938_v7 = vmul.f32 %v1829_v63, %v928_v62  ;;  %1706 = vmatprep.subr.bf16.mxu1 (%p403_p4), %v1899_v3  ;;  %v1141_v62 = vld [vmem:[%s2330_s8 + $0x40] sm:$0xff] (%p403_p4)  ;;  %v1143_v63 = vld [vmem:[%s2330_s8 + $0x50] sm:$0xff] (%p403_p4)  ;;  %v1739_v24 = vpack.c.bf16 (%p403_p4), %v1160_v23, %v1158_v22 }
 0x589   : >> { %v939_v8 = vsub.f32 %v1888_v0, %v938_v7   ;;  %v1725_v7 = vpack.c.bf16 (%p403_p4), %v1143_v63, %v1141_v62 }
 0x58a   : > { %1708 = vmatpush3.bf16.msra.mxu1 (%p403_p4), %v1707_v25  ;;  %v1157_v25 = vld [vmem:[%s2330_s8 + $0xc0] sm:$0xff] (%p403_p4) }
 0x58b   : >> { %v2333_v0 = vmov %v939_v8  ;;  %1709 = vmatprep.subr.bf16.mxu1 (%p403_p4), %v1899_v3  ;;  %v1741_v27 = vpack.c.bf16 (%p403_p4), %v1159_v26, %v1157_v25 }
 0x58c   : > { %v940_v0 = vld [vmem:[%s2326_s4] sm:$0xff] }
 0x58d   : > { %1580 = vmatpush3.msra.mxu0 %v940_v0  ;;  %v1148_v0 = vld [vmem:[%s2330_s8 + $0x78] sm:$0xff] }
 0x58e   : > { %1582 = vmatmul.mubr.msk.f32.vlgmr.msra.gmra.mrb[0].mxu0 %vm414_vm0, %v939_v8  ;;  %1711 = vmatpush3.bf16.msra.mxu1 %v1710_v28  ;;  %v1146_v8 = vld [vmem:[%s2330_s8 + $0x68] sm:$0xff] }
 0x58f   : > { %1241 = vmatprep.mubr.f32.mxu0 %v1897_v9  ;;  %1712 = vmatprep.subr.bf16.mxu1 %v1899_v3  ;;  %v1727_v9 = vpack.c.bf16 %v1148_v0, %v1146_v8  ;;  %v1150_v3 = vld [vmem:[%s2330_s8 + $0x88] sm:$0xff] }
 0x590   : > { %1716 = vmatprep.subr.bf16.mxu0 %v1715_v50  ;;  %v1731_v12 = vpack.c.bf16 %v1152_v4, %v1150_v3  ;;  %v1162_v28 = vld [vmem:[%s2330_s8 + $0xe8] sm:$0xff]  ;;  %v1167_v50 = vlaneseq }
 0x591   : > { %1718 = vmatpush1.bf16.msra.mxu0 %v1717_v52  ;;  %v1743_v30 = vpack.c.bf16 %v1164_v29, %v1162_v28  ;;  %v1165_v52 = vld [vmem:[%s2331_s9] sm:$0x3] }
 0x592   : > { %1714 = vmatpush3.bf16.msra.mxu1 %v1713_v31  ;;  %1720 = vmatprep.subr.bf16.mxu0 %v1719_v55  ;;  %v1161_v31 = vld [vmem:[%s2330_s8 + $0xe0] sm:$0xff]  ;;  %v1168_v49 = vshrl.u32 %v1167_v50, 7  ;;  %v1252_v55 = vunpack.c.l.s4 %v1900_v54  ;;  %vm1268_vm10 = vcmp.lt.s32.totalorder %v1167_v50, 256 }
 0x594   : > { %v1169_v51 = vsub.s32 0, %v1168_v49  ;;  %v1173_v53 = vsub.s32 1, %v1168_v49 }
 0x595   : > { %1722 = vmatpush1.bf16.msra.mxu0 %v1721_v58  ;;  %v1253_v58 = vunpack.c.0.s8 %v1252_v55 }
 0x596   : > { %1724 = vmatprep.subr.bf16.mxu0 %v1723_v61  ;;  %v1170_v56 = vrot.slane %v1165_v52, %v1169_v51  ;;  %v1174_v57 = vrot.slane %v1165_v52, %v1173_v53 }
 0x597   : > { %v1256_v63 = vsub.s32 %v1253_v58, %v1168_v49 }
 0x599   : > { %1726 = vmatpush1.bf16.msra.mxu0 %v1725_v7 }
 0x59a   : > { %1728 = vmatprep.subr.bf16.mxu0 %v1727_v9 }
 0x59d   : > { %1730 = vmatpush1.bf16.msra.mxu0 %v1729_v2 }
 0x59e   : > { %1732 = vmatprep.subr.bf16.mxu0 %v1731_v12 }
 0x5a1   : > { %1734 = vmatpush1.bf16.msra.mxu0 %v1733_v15 }
 0x5a2   : > { %1736 = vmatprep.subr.bf16.mxu0 %v1735_v18 }
 0x5a5   : > { %1738 = vmatpush1.bf16.msra.mxu0 %v1737_v21 }
 0x5a6   : > { %1740 = vmatprep.subr.bf16.mxu0 %v1739_v24 }
 0x5a9   : > { %1742 = vmatpush1.bf16.msra.mxu0 %v1741_v27 }
 0x5aa   : > { %1744 = vmatprep.subr.bf16.mxu0 %v1743_v30 }
 0x661   : > { %v1012_v32 = vpop.f32.mrb[0].mxu0 }
 0x662   : > { %v1013_v33 = vadd.f32 %v1012_v32, %v941_v10  ;;  %v1583_v34 = vpop.f32.mrb[1].mxu0  ;;  %v1163_v10 = vld [vmem:[%s2330_s8 + $0xf0] sm:$0xff] }
 0x663   : > { %v1745_v32 = vpack.c.bf16 %v1163_v10, %v1161_v31 }
 0x664   : > { %v1017_v35 = vand.u32 2147483647, %v1013_v33  ;;  %v1016_v46 = vmax.f32 %v1013_v33, 0.0  ;;  %v1047_v33 = vld [vmem:[%s2329_s7] sm:$0x1] }
 0x665   : > { %1746 = vmatpush1.bf16.msra.mxu0 %v1745_v32 }
 0x666   : > { %v1018_v36 = vsub.f32 0.0, %v1017_v35 }
 0x668   : > { %v1019_v37 = vmul.f32 1.442695, %v1018_v36 }
 0x66a   : > { %1830 = vpow2.f32 %v1019_v37 }
 0x674   : > { %v1831_v38 = vpop.eup %1830 }
 0x675   : > { %v1021_v39 = vadd.f32 1.0, %v1831_v38  ;;  %v1024_v40 = vmul.f32 -0.5, %v1831_v38  ;;  %v1027_v42 = vand.u32 2147483647, %v1831_v38 }
 0x677   : > { %1832 = vlog2.f32 %v1021_v39  ;;  %v1025_v41 = vadd.f32 1.0, %v1024_v40  ;;  %vm1028_vm8 = vcmp.lt.f32.partialorder %v1027_v42, 0.0004427343 }
 0x679   : > { %v1026_v45 = vmul.f32 %v1831_v38, %v1025_v41 }
 0x681   : > { %v1833_v43 = vpop.eup %1832 }
 0x682   : > { %v1023_v44 = vmul.f32 0.6931472, %v1833_v43 }
 0x684   : > { %v1029_v5 = vsel %vm1028_vm8, %v1026_v45, %v1023_v44 }
 0x685   : > { %v1030_v47 = vadd.f32 %v1029_v5, %v1016_v46 }
 0x687   : > { %1617 = vmatmul.mubr.f32.vlgmr.msra.gmra.mrb[0].mxu1 %v1030_v47 }
 0x75a   : > { %v1114_v34 = vpop.f32.mrb[0].mxu1 }
 0x75b   : > { %v1115_v35 = vadd.f32 %v1114_v34, %v1047_v33  ;;  %v1618_v36 = vpop.f32.mrb[1].mxu1 }
 0x75d   : > { %v1119_v37 = vand.u32 2147483647, %v1115_v35  ;;  %v1118_v47 = vmax.f32 %v1115_v35, 0.0 }
 0x75f   : > { %v1120_v38 = vsub.f32 0.0, %v1119_v37 }
 0x761   : > { %v1121_v39 = vmul.f32 1.442695, %v1120_v38 }
 0x763   : > { %1834 = vpow2.f32 %v1121_v39 }
 0x76d   : > { %v1835_v40 = vpop.eup %1834 }
 0x76e   : > { %v1123_v41 = vadd.f32 1.0, %v1835_v40  ;;  %v1126_v42 = vmul.f32 -0.5, %v1835_v40  ;;  %v1129_v44 = vand.u32 2147483647, %v1835_v40 }
 0x770   : > { %1836 = vlog2.f32 %v1123_v41  ;;  %v1127_v43 = vadd.f32 1.0, %v1126_v42  ;;  %vm1130_vm9 = vcmp.lt.f32.partialorder %v1129_v44, 0.0004427343 }
 0x772   : > { %v1128_v5 = vmul.f32 %v1835_v40, %v1127_v43 }
 0x77a   : > { %v1837_v45 = vpop.eup %1836 }
 0x77b   : > { %v1125_v46 = vmul.f32 0.6931472, %v1837_v45 }
 0x77d   : > { %v1131_v48 = vsel %vm1130_vm9, %v1128_v5, %v1125_v46 }
 0x77e   : > { %v1132_v6 = vadd.f32 %v1131_v48, %v1118_v47 }
 0x780   : > { %1242 = vmatmul.mubr.f32.vlgmr.msra.gmra.mrb[2].mxu0 %v1132_v6 }
 0x853   : > { %v1243_v59 = vpop.f32.mrb[2].mxu0 }
 0x854   : > { %v1244_v60 = vadd.f32 %v1243_v59, %v1170_v56  ;;  %v1245_v61 = vpop.f32.mrb[3].mxu0 }
 0x855   : > { %v1246_v62 = vadd.f32 %v1245_v61, %v1174_v57 }
 0x857   : > { %v1250_v7 = vcombine.low %v1244_v60, %v1246_v62 }
 0x859   : > { %v1257_v8 = vrot.slane %v1250_v7, %v1256_v63 }
 0x85b   : > { %v1264_v0 = vrot.slane %v1257_v8, %v1256_v63 }
 0x85d   : > { %1270 = vst.msk [vmem:[%s1988_s11] sm:$0x3] %vm1268_vm10, %v1264_v0 }
 0x85e PF: > { %s20_s13 = sadd.s32 1, %s1868_s13  }
 0x85f   : > { %p17_p5 = scmp.ge.s32.totalorder %s20_s13, 4  }
 0x861   :  { %19 = sbr.rel (!%p17_p5) target bundleno = 1 (0x1), region = 117 }

</bundles_post_ra>
